<compile_context>
chip_gen: v7x
topology: tpu7x:2x2x1
jax: 0.10.0
libtpu: 0.0.40
codegen_flags: <defaults>
</compile_context>

<pallas_src>
import math
from functools import partial

import jax
import jax.numpy as jnp
from jax.experimental import pallas as pl
from jax.experimental.pallas import tpu as pltpu


# 48 MiB: below v7x's 64 MiB physical VMEM (headroom for scratch/semaphores),
# comfortably above the largest double-buffered tile footprint used here.
_VMEM_LIMIT = 48 * 1024 * 1024


# --------------------------------------------------------------- tile helpers

def _round_up(x, m):
    return ((x + m - 1) // m) * m


def _row_tile(m, target=256):
    """Largest divisor of m that is <= target and a multiple of 8, else m."""
    if m <= target:
        return m
    t = (target // 8) * 8
    while t >= 8:
        if m % t == 0:
            return t
        t -= 8
    return m


def _col_tile(n, target=512):
    """Largest divisor of n that is <= target and a multiple of 128, else n."""
    if n <= target:
        return n
    t = (target // 128) * 128
    while t >= 128:
        if n % t == 0:
            return t
        t -= 128
    return n


def _heads_per_group(nh, dh):
    """Heads per attention grid step: smallest group with a 128-lane width,
    or all heads when H < 128 (block then equals the full last dim)."""
    if dh % 128 == 0:
        return 1
    for hg in range(1, nh + 1):
        if nh % hg == 0 and (hg * dh) % 128 == 0:
            return hg
    return nh


# ------------------------------------------------------------------ kernels

def _linear_kernel(x_ref, w_ref, b_ref, o_ref, *, activation):
    # bf16 MXU inputs, f32 accumulation.
    x = x_ref[...].astype(jnp.bfloat16)
    y = jnp.dot(x, w_ref[...], preferred_element_type=jnp.float32)
    y = y + b_ref[...].astype(jnp.float32)
    if activation == "gelu":
        # tanh GELU -> EUP slot (erf polynomial would compete for VALU slots).
        y = jax.nn.gelu(y, approximate=True)
    o_ref[...] = y.astype(o_ref.dtype)


def pallas_linear(x, w, b, activation=None, out_dtype=jnp.bfloat16,
                  tm_target=256, tn_target=512, weight_stationary=False):
    """y = x @ w + b.  Weights bf16 (in, out); activations bf16; f32 accum."""
    M, K = x.shape
    _, N = w.shape
    tm = _row_tile(M, tm_target)
    tn = _col_tile(N, tn_target)
    kernel = partial(_linear_kernel, activation=activation)
    if weight_stationary:
        # Weight block index varies only on the slow grid axis -> the (K, tn)
        # weight tile stays resident across all row tiles (DMA skipped).
        grid = (N // tn, M // tm)
        in_specs = [pl.BlockSpec((tm, K), lambda j, i: (i, 0)),
                    pl.BlockSpec((K, tn), lambda j, i: (0, j)),
                    pl.BlockSpec((1, tn), lambda j, i: (0, j))]
        out_spec = pl.BlockSpec((tm, tn), lambda j, i: (i, j))
        sem = ("parallel", "arbitrary")
    else:
        grid = (M // tm, N // tn)
        in_specs = [pl.BlockSpec((tm, K), lambda i, j: (i, 0)),
                    pl.BlockSpec((K, tn), lambda i, j: (0, j)),
                    pl.BlockSpec((1, tn), lambda i, j: (0, j))]
        out_spec = pl.BlockSpec((tm, tn), lambda i, j: (i, j))
        sem = ("parallel", "parallel")
    return pl.pallas_call(
        kernel,
        out_shape=jax.ShapeDtypeStruct((M, N), out_dtype),
        grid=grid,
        in_specs=in_specs,
        out_specs=out_spec,
        compiler_params=pltpu.CompilerParams(
            dimension_semantics=sem, vmem_limit_bytes=_VMEM_LIMIT),
    )(x, w, b.reshape(1, N))


def _qkv_kernel(x_ref, qw_ref, kw_ref, vw_ref, qb_ref, kb_ref, vb_ref,
                q_out, k_out, v_out):
    # One pass over the activation tile feeds all three projections.
    x = x_ref[...].astype(jnp.bfloat16)
    q = jnp.dot(x, qw_ref[...], preferred_element_type=jnp.float32)
    k = jnp.dot(x, kw_ref[...], preferred_element_type=jnp.float32)
    v = jnp.dot(x, vw_ref[...], preferred_element_type=jnp.float32)
    q_out[...] = (q + qb_ref[...].astype(jnp.float32)).astype(q_out.dtype)
    k_out[...] = (k + kb_ref[...].astype(jnp.float32)).astype(k_out.dtype)
    v_out[...] = (v + vb_ref[...].astype(jnp.float32)).astype(v_out.dtype)


def pallas_qkv(x, qw, kw, vw, qb, kb, vb, tm_target=256):
    """Fused Q/K/V projections; returns three (M, H) bf16 arrays (no HBM
    slicing of a concatenated 3H output, no head transposes)."""
    M, H = x.shape
    tm = _row_tile(M, tm_target)
    row = pl.BlockSpec((tm, H), lambda i: (i, 0))
    wspec = pl.BlockSpec((H, H), lambda i: (0, 0))
    bspec = pl.BlockSpec((1, H), lambda i: (0, 0))
    out = jax.ShapeDtypeStruct((M, H), jnp.bfloat16)
    return pl.pallas_call(
        _qkv_kernel,
        out_shape=(out, out, out),
        grid=(M // tm,),
        in_specs=[row, wspec, wspec, wspec, bspec, bspec, bspec],
        out_specs=(row, row, row),
        compiler_params=pltpu.CompilerParams(
            dimension_semantics=("parallel",), vmem_limit_bytes=_VMEM_LIMIT),
    )(x, qw, kw, vw, qb.reshape(1, H), kb.reshape(1, H), vb.reshape(1, H))


def _linear_ln_kernel(*refs, eps, activation, has_residual):
    # Fused: x @ w + b [-> GELU] [-> + residual] -> LayerNorm.
    if has_residual:
        x_ref, w_ref, b_ref, r_ref, g_ref, bt_ref, o_ref = refs
    else:
        x_ref, w_ref, b_ref, g_ref, bt_ref, o_ref = refs
        r_ref = None
    x = x_ref[...].astype(jnp.bfloat16)
    y = jnp.dot(x, w_ref[...], preferred_element_type=jnp.float32)
    y = y + b_ref[...].astype(jnp.float32)
    if activation == "gelu":
        y = jax.nn.gelu(y, approximate=True)
    if r_ref is not None:
        y = y + r_ref[...].astype(jnp.float32)
    mu = jnp.mean(y, axis=-1, keepdims=True)
    var = jnp.mean(jnp.square(y - mu), axis=-1, keepdims=True)
    y = (y - mu) * jax.lax.rsqrt(var + eps)
    y = y * g_ref[...].astype(jnp.float32) + bt_ref[...].astype(jnp.float32)
    o_ref[...] = y.astype(o_ref.dtype)


def pallas_linear_ln(x, w, b, gamma, beta, eps, residual=None, activation=None,
                     out_dtype=jnp.bfloat16, tm_target=256):
    """Linear whose output width is H (single lane-dense N tile), with the
    bias/GELU/residual/LayerNorm epilogue fused in (no extra HBM round trip)."""
    M, K = x.shape
    _, N = w.shape
    tm = _row_tile(M, tm_target)
    row_in = pl.BlockSpec((tm, K), lambda i: (i, 0))
    row_out = pl.BlockSpec((tm, N), lambda i: (i, 0))
    wspec = pl.BlockSpec((K, N), lambda i: (0, 0))
    vec = pl.BlockSpec((1, N), lambda i: (0, 0))
    has_res = residual is not None
    kernel = partial(_linear_ln_kernel, eps=eps, activation=activation,
                     has_residual=has_res)
    in_specs = [row_in, wspec, vec]
    args = [x, w, b.reshape(1, N)]
    if has_res:
        in_specs.append(row_out)
        args.append(residual)
    in_specs += [vec, vec]
    args += [gamma.reshape(1, N), beta.reshape(1, N)]
    return pl.pallas_call(
        kernel,
        out_shape=jax.ShapeDtypeStruct((M, N), out_dtype),
        grid=(M // tm,),
        in_specs=in_specs,
        out_specs=row_out,
        compiler_params=pltpu.CompilerParams(
            dimension_semantics=("parallel",), vmem_limit_bytes=_VMEM_LIMIT),
    )(*args)


def _layernorm_kernel(x_ref, g_ref, b_ref, o_ref, *, eps):
    x = x_ref[...].astype(jnp.float32)
    mu = jnp.mean(x, axis=-1, keepdims=True)
    var = jnp.mean(jnp.square(x - mu), axis=-1, keepdims=True)
    y = (x - mu) * jax.lax.rsqrt(var + eps)
    o_ref[...] = (y * g_ref[...] + b_ref[...]).astype(o_ref.dtype)


def pallas_layernorm(x, gamma, beta, eps, out_dtype=jnp.bfloat16, tm_target=256):
    M, H = x.shape
    tm = _row_tile(M, tm_target)
    row = pl.BlockSpec((tm, H), lambda i: (i, 0))
    vec = pl.BlockSpec((1, H), lambda i: (0, 0))
    return pl.pallas_call(
        partial(_layernorm_kernel, eps=eps),
        out_shape=jax.ShapeDtypeStruct((M, H), out_dtype),
        grid=(M // tm,),
        in_specs=[row, vec, vec],
        out_specs=row,
        compiler_params=pltpu.CompilerParams(dimension_semantics=("parallel",)),
    )(x, gamma.reshape(1, H), beta.reshape(1, H))


def _attention_kernel(q_ref, k_ref, v_ref, m_ref, o_ref, *, scale, heads, dh):
    # One (batch, head-group) per grid step.  q/k/v blocks are (1, S, heads*dh)
    # in (B, S, H) layout; heads are split in-kernel (no HBM transposes).
    qg = q_ref[0].astype(jnp.bfloat16)          # (S, heads*dh)
    kg = k_ref[0].astype(jnp.bfloat16)
    vg = v_ref[0].astype(jnp.bfloat16)
    mask = m_ref[0].astype(jnp.float32)         # (1, S) additive key mask
    outs = []
    for h in range(heads):                      # small unrolled loop (1-2 heads)
        sl = slice(h * dh, (h + 1) * dh)
        s = jax.lax.dot_general(
            qg[:, sl], kg[:, sl],
            dimension_numbers=(((1,), (1,)), ((), ())),
            preferred_element_type=jnp.float32) * scale          # (S, S)
        s = s + mask
        s = s - jnp.max(s, axis=-1, keepdims=True)
        p = jnp.exp(s)
        p = p * pl.reciprocal(jnp.sum(p, axis=-1, keepdims=True), approx=True)
        outs.append(jnp.dot(p.astype(jnp.bfloat16), vg[:, sl],
                            preferred_element_type=jnp.float32))  # (S, dh)
    o = outs[0] if heads == 1 else jnp.concatenate(outs, axis=-1)
    o_ref[0] = o.astype(o_ref.dtype)            # single lane-dense store


def pallas_attention(q, k, v, mask_bias, nh, dh):
    """q/k/v: (B, S, H) bf16; mask_bias: (B, 1, S) additive (-10000 masked)."""
    B, S, H = q.shape
    hg = _heads_per_group(nh, dh)               # 128-lane head groups
    ng = nh // hg
    blk = pl.BlockSpec((1, S, hg * dh), lambda b, g: (b, 0, g))
    return pl.pallas_call(
        partial(_attention_kernel, scale=1.0 / math.sqrt(dh), heads=hg, dh=dh),
        out_shape=jax.ShapeDtypeStruct((B, S, H), q.dtype),
        grid=(B, ng),
        in_specs=[blk, blk, blk,
                  pl.BlockSpec((1, 1, S), lambda b, g: (b, 0, 0))],
        out_specs=blk,
        compiler_params=pltpu.CompilerParams(
            dimension_semantics=("parallel", "parallel"),
            vmem_limit_bytes=_VMEM_LIMIT),
    )(q, k, v, mask_bias)


def _ce_kernel(s_ref, l_ref, loss_ref, m_sc, l_sc, p_sc, sum_sc, cnt_sc, *, V, tv):
    # Online log-sum-exp over vocab tiles; pad columns (>= V) masked out.
    i = pl.program_id(0)
    j = pl.program_id(1)
    nv = pl.num_programs(1)

    @pl.when(jnp.logical_and(i == 0, j == 0))
    def _():
        sum_sc[...] = jnp.zeros_like(sum_sc)
        cnt_sc[...] = jnp.zeros_like(cnt_sc)

    @pl.when(j == 0)
    def _():
        m_sc[...] = jnp.full_like(m_sc, -1e30)
        l_sc[...] = jnp.zeros_like(l_sc)
        p_sc[...] = jnp.zeros_like(p_sc)

    s = s_ref[...].astype(jnp.float32)                           # (tm, tv)
    col = jax.lax.broadcasted_iota(jnp.int32, s.shape, 1) + j * tv
    s = jnp.where(col < V, s, -1e30)                             # mask pad vocab
    labels = l_ref[...]                                          # (tm, 1) int32

    p_sc[...] += jnp.sum(jnp.where(col == labels, s, 0.0), axis=-1, keepdims=True)
    m_new = jnp.maximum(m_sc[...], jnp.max(s, axis=-1, keepdims=True))
    l_sc[...] = (l_sc[...] * jnp.exp(m_sc[...] - m_new)
                 + jnp.sum(jnp.exp(s - m_new), axis=-1, keepdims=True))
    m_sc[...] = m_new

    @pl.when(j == nv - 1)
    def _():
        lse = m_sc[...] + jnp.log(l_sc[...])
        valid = (labels != -100).astype(jnp.float32)             # ignore_index=-100
        sum_sc[...] += jnp.sum((lse - p_sc[...]) * valid)
        cnt_sc[...] += jnp.sum(valid)
        loss_ref[...] = sum_sc[...] / jnp.maximum(cnt_sc[...], 1.0)


def pallas_cross_entropy(scores_padded, labels, vocab_size,
                         tm_target=256, tv_target=2048):
    """Mean token CE (torch.nn.CrossEntropyLoss, ignore_index=-100) over bf16
    scores whose vocab axis is padded to a 128-multiple."""
    M, Vp = scores_padded.shape
    tm = _row_tile(M, tm_target)
    tv = _col_tile(Vp, tv_target)
    loss = pl.pallas_call(
        partial(_ce_kernel, V=vocab_size, tv=tv),
        out_shape=jax.ShapeDtypeStruct((1, 1), jnp.float32),
        grid=(M // tm, Vp // tv),
        in_specs=[
            pl.BlockSpec((tm, tv), lambda i, j: (i, j)),
            pl.BlockSpec((tm, 1), lambda i, j: (i, 0)),
        ],
        out_specs=pl.BlockSpec((1, 1), lambda i, j: (0, 0)),
        scratch_shapes=[pltpu.VMEM((tm, 1), jnp.float32),   # running max
                        pltpu.VMEM((tm, 1), jnp.float32),   # running sum-exp
                        pltpu.VMEM((tm, 1), jnp.float32),   # picked logit
                        pltpu.VMEM((1, 1), jnp.float32),    # loss sum
                        pltpu.VMEM((1, 1), jnp.float32)],   # valid count
        compiler_params=pltpu.CompilerParams(
            dimension_semantics=("arbitrary", "arbitrary"),
            vmem_limit_bytes=_VMEM_LIMIT),
    )(scores_padded, labels.reshape(M, 1).astype(jnp.int32))
    return loss[0, 0]


# -------------------------------------------------------------- parameters

def _normal(key, shape, std):
    return (jax.random.normal(key, shape, jnp.float32) * std).astype(jnp.float32)


def init_params(key, cfg):
    H = cfg["hidden_size"]
    I = cfg["intermediate_size"]
    V = cfg["vocab_size"]
    std = cfg["initializer_range"]
    bf16 = jnp.bfloat16

    # Padded vocab so the decoder matmul / CE kernel tile the vocab axis.
    Vp = _round_up(V, 512) if V >= 512 else _round_up(V, 128)

    keys = iter(jax.random.split(key, 3 + 6 * cfg["num_layers"] + 2))

    params = {
        "word_emb": _normal(next(keys), (V, H), std).at[0].set(0.0),  # padding_idx=0
        "pos_emb": _normal(next(keys), (cfg["max_position"], H), std),
        "type_emb": _normal(next(keys), (cfg["type_vocab_size"], H), std),
        "emb_ln_g": jnp.ones((H,), jnp.float32),
        "emb_ln_b": jnp.zeros((H,), jnp.float32),
        "layers": [],
        "vocab_padded": Vp,
    }
    for _ in range(cfg["num_layers"]):
        layer = {
            "q_w": _normal(next(keys), (H, H), std).astype(bf16),
            "k_w": _normal(next(keys), (H, H), std).astype(bf16),
            "v_w": _normal(next(keys), (H, H), std).astype(bf16),
            "q_b": jnp.zeros((H,), jnp.float32),
            "k_b": jnp.zeros((H,), jnp.float32),
            "v_b": jnp.zeros((H,), jnp.float32),
            "ao_w": _normal(next(keys), (H, H), std).astype(bf16),
            "ao_b": jnp.zeros((H,), jnp.float32),
            "attn_ln_g": jnp.ones((H,), jnp.float32),
            "attn_ln_b": jnp.zeros((H,), jnp.float32),
            "i_w": _normal(next(keys), (H, I), std).astype(bf16),
            "i_b": jnp.zeros((I,), jnp.float32),
            "o_w": _normal(next(keys), (I, H), std).astype(bf16),
            "o_b": jnp.zeros((H,), jnp.float32),
            "out_ln_g": jnp.ones((H,), jnp.float32),
            "out_ln_b": jnp.zeros((H,), jnp.float32),
        }
        params["layers"].append(layer)

    dec_w = _normal(next(keys), (H, V), std)
    dec_w = jnp.pad(dec_w, ((0, 0), (0, Vp - V))).astype(bf16)    # pad cols = 0
    params.update({
        "head_t_w": _normal(next(keys), (H, H), std).astype(bf16),
        "head_t_b": jnp.zeros((H,), jnp.float32),
        "head_ln_g": jnp.ones((H,), jnp.float32),
        "head_ln_b": jnp.zeros((H,), jnp.float32),
        "dec_w": dec_w,
        "dec_b": jnp.zeros((Vp,), jnp.float32),
    })
    return params


# ------------------------------------------------------------------ forward

def bert_mlm_forward(params, cfg, input_ids, attention_mask, labels):
    B, S = input_ids.shape
    H = cfg["hidden_size"]
    nh = cfg["num_heads"]
    dh = H // nh
    eps = cfg["layer_norm_eps"]
    V = cfg["vocab_size"]
    M = B * S

    # ---- embeddings (gather glue in plain JAX, f32) ----
    we = params["word_emb"][input_ids]                          # (B, S, H)
    pe = params["pos_emb"][jnp.arange(S)]                       # (S, H)
    te = params["type_emb"][jnp.zeros((B, S), jnp.int32)]       # (B, S, H)
    emb = (we + pe[None, :, :] + te).reshape(M, H)
    x = pallas_layernorm(emb, params["emb_ln_g"], params["emb_ln_b"], eps)  # bf16

    # ---- extended attention mask: (1 - mask) * -10000, kept at (B, 1, S) ----
    mask_bias = ((1.0 - attention_mask.astype(jnp.float32)) * -10000.0)[:, None, :]

    # ---- encoder layers ----
    for layer in params["layers"]:
        q, k, v = pallas_qkv(x, layer["q_w"], layer["k_w"], layer["v_w"],
                             layer["q_b"], layer["k_b"], layer["v_b"])
        ctx = pallas_attention(q.reshape(B, S, H), k.reshape(B, S, H),
                               v.reshape(B, S, H), mask_bias, nh, dh)
        ctx = ctx.reshape(M, H)
        # attention output proj + bias + residual + LayerNorm, fused
        x = pallas_linear_ln(ctx, layer["ao_w"], layer["ao_b"],
                             layer["attn_ln_g"], layer["attn_ln_b"], eps,
                             residual=x)
        # FFN intermediate (weight-stationary, tanh GELU)
        inter = pallas_linear(x, layer["i_w"], layer["i_b"], activation="gelu",
                              weight_stationary=True, tn_target=1024)
        # FFN output proj + bias + residual + LayerNorm, fused
        x = pallas_linear_ln(inter, layer["o_w"], layer["o_b"],
                             layer["out_ln_g"], layer["out_ln_b"], eps,
                             residual=x)

    # ---- MLM head: dense -> GELU -> LayerNorm (fused) -> decoder (vocab-tiled) ----
    h = pallas_linear_ln(x, params["head_t_w"], params["head_t_b"],
                         params["head_ln_g"], params["head_ln_b"], eps,
                         activation="gelu")
    scores_p = pallas_linear(h, params["dec_w"], params["dec_b"],
                             weight_stationary=True, tn_target=512)   # (M, Vp) bf16

    # ---- cross-entropy over flattened tokens (ignore_index=-100) ----
    mlm_loss = pallas_cross_entropy(scores_p, labels.reshape(-1), V)

    scores = scores_p[:, :V].astype(jnp.float32).reshape(B, S, V)
    return mlm_loss, scores


# --------------------------------------------------------------------- main

if __name__ == "__main__":
    cfg = dict(
        vocab_size=200,          # deliberately not a 128-multiple: exercises padding
        hidden_size=32,
        num_heads=2,
        num_layers=2,
        intermediate_size=64,
        max_position=16,
        type_vocab_size=2,
        initializer_range=0.02,
        layer_norm_eps=1e-12,
    )
    B, S = 2, 8

    key = jax.random.PRNGKey(0)
    k_ids, k_lbl, k_par = jax.random.split(key, 3)

    input_ids = jax.random.randint(k_ids, (B, S), 1, cfg["vocab_size"], dtype=jnp.int32)
    attention_mask = jnp.ones((B, S), jnp.int32).at[1, 6:].set(0)
    labels = jax.random.randint(k_lbl, (B, S), 0, cfg["vocab_size"], dtype=jnp.int32)
    labels = labels.at[0, 0].set(-100)   # exercise ignore_index path

    params = init_params(k_par, cfg)

    loss, scores = bert_mlm_forward(params, cfg, input_ids, attention_mask, labels)
    jax.block_until_ready((loss, scores))

    assert scores.shape == (B, S, cfg["vocab_size"])
    assert loss.shape == ()
    assert bool(jnp.isfinite(loss))
    assert bool(jnp.all(jnp.isfinite(scores)))
    print("KERNEL_OK")
</pallas_src>

<mosaic_0001>
module attributes {stable_mosaic.version = 11 : i64} {
  func.func @_layernorm_kernel(%arg0: i32, %arg1: memref<16x32xf32, #tpu.memory_space<vmem>>, %arg2: memref<1x32xf32, #tpu.memory_space<vmem>>, %arg3: memref<1x32xf32, #tpu.memory_space<vmem>>, %arg4: memref<16x32xbf16, #tpu.memory_space<vmem>>) attributes {dimension_semantics = [#tpu.dimension_semantics<parallel>], iteration_bounds = array<i64: 1>, scalar_prefetch = 0 : i64, scratch_operands = 0 : i64, tpu.core_type = #tpu.core_type<tc>, window_params = [{transform_indices = @transform_0, window_bounds = array<i64: 16, 32>}, {pipeline_mode = #tpu.pipeline_mode<synchronous>, transform_indices = @transform_1, window_bounds = array<i64: 1, 32>}, {pipeline_mode = #tpu.pipeline_mode<synchronous>, transform_indices = @transform_2, window_bounds = array<i64: 1, 32>}, {transform_indices = @transform_3, window_bounds = array<i64: 16, 32>}]} {
    %c0 = arith.constant 0 : index
    %c0_0 = arith.constant 0 : index
    %0 = vector.load %arg1[%c0, %c0_0] : memref<16x32xf32, #tpu.memory_space<vmem>>, vector<16x32xf32>
    %cst = arith.constant dense<0.000000e+00> : vector<16xf32>
    %1 = vector.multi_reduction <add>, %0, %cst [1] : vector<16x32xf32> to vector<16xf32>
    %2 = vector.shape_cast %1 : vector<16xf32> to vector<16x1xf32>
    %cst_1 = arith.constant 3.200000e+01 : f32
    %3 = vector.broadcast %cst_1 : f32 to vector<16x1xf32>
    %4 = arith.divf %2, %3 : vector<16x1xf32>
    %5 = vector.broadcast %4 : vector<16x1xf32> to vector<16x32xf32>
    %6 = arith.subf %0, %5 : vector<16x32xf32>
    %7 = arith.mulf %6, %6 : vector<16x32xf32>
    %cst_2 = arith.constant dense<0.000000e+00> : vector<16xf32>
    %8 = vector.multi_reduction <add>, %7, %cst_2 [1] : vector<16x32xf32> to vector<16xf32>
    %9 = vector.shape_cast %8 : vector<16xf32> to vector<16x1xf32>
    %cst_3 = arith.constant 3.200000e+01 : f32
    %10 = vector.broadcast %cst_3 : f32 to vector<16x1xf32>
    %11 = arith.divf %9, %10 : vector<16x1xf32>
    %12 = vector.broadcast %4 : vector<16x1xf32> to vector<16x32xf32>
    %13 = arith.subf %0, %12 : vector<16x32xf32>
    %cst_4 = arith.constant 9.99999996E-13 : f32
    %14 = vector.broadcast %cst_4 : f32 to vector<16x1xf32>
    %15 = arith.addf %11, %14 : vector<16x1xf32>
    %16 = math.rsqrt %15 : vector<16x1xf32>
    %17 = vector.broadcast %16 : vector<16x1xf32> to vector<16x32xf32>
    %18 = arith.mulf %13, %17 : vector<16x32xf32>
    %c0_5 = arith.constant 0 : index
    %c0_6 = arith.constant 0 : index
    %19 = vector.load %arg2[%c0_5, %c0_6] : memref<1x32xf32, #tpu.memory_space<vmem>>, vector<1x32xf32>
    %20 = vector.broadcast %19 : vector<1x32xf32> to vector<16x32xf32>
    %21 = arith.mulf %18, %20 : vector<16x32xf32>
    %c0_7 = arith.constant 0 : index
    %c0_8 = arith.constant 0 : index
    %22 = vector.load %arg3[%c0_7, %c0_8] : memref<1x32xf32, #tpu.memory_space<vmem>>, vector<1x32xf32>
    %23 = vector.broadcast %22 : vector<1x32xf32> to vector<16x32xf32>
    %24 = arith.addf %21, %23 : vector<16x32xf32>
    %25 = arith.truncf %24 : vector<16x32xf32> to vector<16x32xbf16>
    %c0_9 = arith.constant 0 : index
    %c0_10 = arith.constant 0 : index
    %26 = vector.load %arg4[%c0_9, %c0_10] : memref<16x32xbf16, #tpu.memory_space<vmem>>, vector<16x32xbf16>
    tpu.vector_store %arg4[%c0_9, %c0_10], %25 {strides = array<i32>} : memref<16x32xbf16, #tpu.memory_space<vmem>>, vector<16x32xbf16>,
    return
  }
  func.func @transform_0(%arg0: i32) -> (i32, i32) {
    %c0_i32 = arith.constant 0 : i32
    %c0_i32_0 = arith.constant 0 : i32
    return %arg0, %c0_i32 : i32, i32
  }
  func.func @transform_1(%arg0: i32) -> (i32, i32) {
    %c0_i32 = arith.constant 0 : i32
    %c0_i32_0 = arith.constant 0 : i32
    %c0_i32_1 = arith.constant 0 : i32
    return %c0_i32, %c0_i32_0 : i32, i32
  }
  func.func @transform_2(%arg0: i32) -> (i32, i32) {
    %c0_i32 = arith.constant 0 : i32
    %c0_i32_0 = arith.constant 0 : i32
    %c0_i32_1 = arith.constant 0 : i32
    return %c0_i32, %c0_i32_0 : i32, i32
  }
  func.func @transform_3(%arg0: i32) -> (i32, i32) {
    %c0_i32 = arith.constant 0 : i32
    %c0_i32_0 = arith.constant 0 : i32
    return %arg0, %c0_i32 : i32, i32
  }
}

</mosaic_0001>

<bundles_post_ra>
// kernel: tpu_custom_call.1
= control target key start
LH: loop header
LB: loop body
LE: loop exit
PB: predicated region body
PF: predicated region fallthrough
CT: control target
= control target key end

     0   :  { %8 = vsyncpa [#allocation3], 0  ;;  %s229_s0 = inlined_call_operand.hbm [shape: f32[16,32], index: 0, kind: input, shape index: {}]   ;;  %s230_s1 = inlined_call_operand.vmem [shape: f32[1,32], index: 1, kind: input, shape index: {}]   ;;  %s231_s2 = inlined_call_operand.vmem [shape: f32[1,32], index: 2, kind: input, shape index: {}]   ;;  %s232_s3 = inlined_call_operand.hbm [shape: bf16[16,32], index: 3, kind: output, shape index: {}]  }
   0x1   :  { %9 = vsyncpa [#allocation4], 0  ;;  %s169_s12 = smov [#allocation2]   ;;  %s121_s16 = scalar_lea.hbm %s229_s0, 256 }
   0x2   :  { %s15_s13 = sshll.u32 %s169_s12, 4  ;;  %p122_p0 = scmp.ne.s32.totalorder %s229_s0, %s121_s16  ;;  %s16_s13 = int_to_ptr.vmem [resolvable:$true] %s15_s13 }
   0x3   :  { %p125_p1 = scmp.lt.u32.totalorder %s121_s16, %s229_s0 }
   0x5   :  { %p127_p2 = pnand %p125_p1, %p122_p0 }
   0x7   :  { %130 = shalt.err (!%p127_p2)
}
   0x8   :  { %s131_s21 = scalar_lea.vmem %s16_s13, 256  ;;  %p136_p4 = scmp.lt.s32.totalorder %s16_s13, %s16_s13 }
   0x9   :  { %p132_p3 = scmp.ne.s32.totalorder %s16_s13, %s131_s21  ;;  %p137_p5 = scmp.lt.s32.totalorder %s131_s21, %s131_s21 }
   0xb   :  { %p138_p6 = por %p137_p5, %p136_p4 }
   0xd   :  { %p139_p7 = pnand %p138_p6, %p132_p3 }
   0xf   :  { %142 = shalt.err (!%p139_p7)
}
  0x10   :  { %s170_s22 = smov 128   ;;  %s171_s23 = smov 8  }
  0x11   :  { %21 = dma.hbm_to_vmem [thread:$0]  %s229_s0, 256, %s16_s13, [#allocation3], %s170_s22, %s170_s22, %s171_s23  }
  0x12   :  { %165 = dma.done.wait [#allocation3], 256  }
  0x13   :  { %166 = vsyncadd [#allocation3], 4294967040  ;;  %vm31_vm0 = vcmask 261120   ;;  %v29_v0 = vld [vmem:[#allocation2] sm:$0xff]  ;;  %v30_v1 = vld [vmem:[#allocation2 + $0x8] sm:$0xff]  ;;  %vm85_vm1 = vcmask 257024  }
  0x14   :  { %v32_v2 = vsel %vm31_vm0, %v29_v0, 0.0  ;;  %v35_v3 = vsel %vm31_vm0, %v30_v1, 0.0  ;;  %v105_v21 = vld [vmem:[%s230_s1] ss:$0 sm:$0xff]  ;;  %s172_s29 = smov [#allocation5]  }
  0x15   :  { %33 = vadd.xlane.f32.xlu0 %v32_v2  ;;  %v106_v23 = vld [vmem:[%s231_s2] ss:$0 sm:$0xff]  ;;  %s93_s30 = sshll.u32 %s172_s29, 4  ;;  %s94_s30 = int_to_ptr.vmem [resolvable:$true] %s93_s30 }
  0x16   :  { %s143_s1 = scalar_lea.vmem %s94_s30, 128  ;;  %p148_p9 = scmp.lt.s32.totalorder %s94_s30, %s94_s30 }
  0x17   :  { %p144_p8 = scmp.ne.s32.totalorder %s94_s30, %s143_s1  ;;  %p149_p10 = scmp.lt.s32.totalorder %s143_s1, %s143_s1 }
  0x19   :  { %36 = vadd.xlane.f32.xlu0 %v35_v3  ;;  %p150_p11 = por %p149_p10, %p148_p9 }
  0x1b   :  { %p151_p12 = pnand %p150_p11, %p144_p8 }
  0xa2   :  { %v34_v4 = vpop.xlane.xlu0 %33 }
  0xa3   :  { %v39_v5 = vmul.f32 0.03125, %v34_v4 }
  0xa5   :  { %v41_v6 = vsub.f32 %v29_v0, %v39_v5 }
  0xa6   :  { %v37_v7 = vpop.xlane.xlu0 %36 }
  0xa7   :  { %v40_v8 = vmul.f32 0.03125, %v37_v7  ;;  %v43_v9 = vmul.f32 %v41_v6, %v41_v6 }
  0xa9   :  { %v42_v10 = vsub.f32 %v30_v1, %v40_v8  ;;  %v45_v11 = vsel %vm31_vm0, %v43_v9, 0.0 }
  0xaa   :  { %46 = vadd.xlane.f32.xlu1 %v45_v11 }
  0xab   :  { %v44_v12 = vmul.f32 %v42_v10, %v42_v10 }
  0xad   :  { %v48_v13 = vsel %vm31_vm0, %v44_v12, 0.0 }
  0xae   :  { %49 = vadd.xlane.f32.xlu1 %v48_v13 }
 0x137   :  { %v47_v14 = vpop.xlane.xlu1 %46 }
 0x138   :  { %v51_v15 = vmul.f32 0.03125, %v47_v14 }
 0x13a   :  { %v53_v16 = vadd.f32 1e-12, %v51_v15 }
 0x13b   :  { %v50_v17 = vpop.xlane.xlu1 %49 }
 0x13c   :  { %117 = vrsqrt.f32 %v53_v16  ;;  %v52_v18 = vmul.f32 0.03125, %v50_v17 }
 0x13e   :  { %v54_v19 = vadd.f32 1e-12, %v52_v18 }
 0x140   :  { %119 = vrsqrt.f32 %v54_v19 }
 0x146   :  { %v118_v20 = vpop.eup %117 }
 0x147   :  { %v57_v22 = vmul.f32 %v118_v20, %v41_v6 }
 0x149   :  { %v66_v24 = vmul.f32 %v105_v21, %v57_v22 }
 0x14a   :  { %v120_v25 = vpop.eup %119 }
 0x14b   :  { %v58_v26 = vmul.f32 %v120_v25, %v42_v10  ;;  %v75_v27 = vadd.f32 %v106_v23, %v66_v24 }
 0x14d   :  { %v67_v28 = vmul.f32 %v105_v21, %v58_v26  ;;  %v109_v29 = vpack.c.bf16 %v75_v27, %v75_v27 }
 0x14f   :  { %v76_v30 = vadd.f32 %v106_v23, %v67_v28  ;;  %86 = vst.msk [vmem:[#allocation5] sm:$0xf] %vm85_vm1, %v109_v29 }
 0x151   :  { %v110_v31 = vpack.c.bf16 %v76_v30, %v76_v30 }
 0x153   :  { %87 = vst.msk [vmem:[#allocation5 + $0x4] sm:$0xf] %vm85_vm1, %v110_v31 }
 0x154   :  { %154 = shalt.err (!%p151_p12)
}
 0x155   :  { %s155_s5 = scalar_lea.hbm %s232_s3, 128 }
 0x156   :  { %p156_p13 = scmp.ne.s32.totalorder %s232_s3, %s155_s5  ;;  %p159_p0 = scmp.lt.u32.totalorder %s155_s5, %s232_s3 }
 0x158   :  { %p161_p1 = pnand %p159_p0, %p156_p13 }
 0x15a   :  { %164 = shalt.err (!%p161_p1)
}
 0x15b   :  { %s173_s10 = smov 64   ;;  %s174_s11 = smov 4  }
 0x15c   :  { %99 = dma.vmem_to_hbm [thread:$0]  %s94_s30, 128, %s232_s3, [#allocation4], %s173_s10, %s173_s10, %s174_s11  }
 0x15d   :  { %167 = dma.done.wait [#allocation4], 128  }
 0x15e   :  { %168 = vsyncadd [#allocation4], 4294967168 }
 0x15f   :  { %103 = vsyncpa [#allocation3], 1 }
 0x160   :  { %104 = vsyncpa [#allocation4], 1 }

</bundles_post_ra>
